<compile_context>
chip_gen: v6e
topology: v6e:2x2x1
jax: 0.10.0
libtpu: 0.0.40
codegen_flags: <defaults>
</compile_context>

<pallas_src>
import jax
import jax.numpy as jnp
from jax.experimental import pallas as pl
from jax.experimental.pallas import tpu as pltpu


def _round_up(x: int, m: int) -> int:
    return (x + m - 1) // m * m


def _cdiv(a: int, b: int) -> int:
    return -(-a // b)


# ---------------------------------------------------------------------------
# Pallas kernel: one (TM, K) x (K, N_pad) matmul tile + bias, fp32 accumulate.
# ---------------------------------------------------------------------------
def _conv_matmul_kernel(patches_ref, w_ref, b_ref, out_ref):
    # patches_ref: (TM, K)     bf16/fp32 im2col patch row-tile (streamed)
    # w_ref:       (K, N_pad)  conv weights, N zero-padded, resident
    # b_ref:       (1, N_pad)  fp32 bias, N zero-padded, resident
    acc = jnp.dot(patches_ref[...], w_ref[...],
                  preferred_element_type=jnp.float32)
    out_ref[...] = (acc + b_ref[...]).astype(out_ref.dtype)


def _strided_conv_pallas(x, weight, bias, stride, *,
                         compute_dtype=jnp.bfloat16,
                         out_dtype=jnp.bfloat16,
                         tm=1024):
    """Strided conv (kernel == stride) via im2col + Pallas MXU matmul.

    x:      (B, C_in, H, W)  NCHW (PyTorch convention)
    weight: (C_in*stride*stride, C_out)
    bias:   (1, C_out)
    returns (B, Ho, Wo, C_out)  NHWC in `out_dtype` (lane-dense; caller
            transposes to NCHW only if it really needs to).
    """
    B, Cin, H, W = x.shape
    Ho, Wo = H // stride, W // stride
    assert Ho >= 1 and Wo >= 1, "input smaller than the reduction stride"
    if H != Ho * stride or W != Wo * stride:
        # PyTorch conv semantics: floor the output size, drop trailing rows/cols.
        x = x[:, :, :Ho * stride, :Wo * stride]

    K, Cout = weight.shape
    assert K == Cin * stride * stride

    M = B * Ho * Wo
    N_pad = _round_up(Cout, 128)           # lane-dense output tile

    # Row tile: multiple of 16 (bf16 sublane packing); large to amortize the
    # per-grid-step overhead; >=2 grid steps so v7x megacore can split M.
    TM = _round_up(min(tm, _round_up(M, 16)), 16)
    if _cdiv(M, TM) < 2 and TM > 16:
        TM = _round_up(_cdiv(M, 2), 16)
    M_pad = _round_up(M, TM)

    # im2col for kernel==stride (non-overlapping patches).  The transpose,
    # dtype cast and M-padding below form a single XLA producer fusion;
    # allow_input_fusion lets XLA fold it into the pallas_call input DMA so
    # the (M, K) patches tensor is not materialized + re-read from HBM.
    patches = x.reshape(B, Cin, Ho, stride, Wo, stride)
    patches = patches.transpose(0, 2, 4, 1, 3, 5).reshape(M, K)
    patches = patches.astype(compute_dtype)
    if M_pad != M:
        # Padded rows are zeros; they produce plain `bias` in the output and
        # are sliced off below -- never remove the [:M] slice.
        patches = jnp.pad(patches, ((0, M_pad - M), (0, 0)))

    # K is intentionally NOT padded (full-array last dim is a legal block dim).
    w = weight.astype(compute_dtype)
    b = bias.astype(jnp.float32).reshape(1, Cout)
    if N_pad != Cout:
        w = jnp.pad(w, ((0, 0), (0, N_pad - Cout)))
        b = jnp.pad(b, ((0, 0), (0, N_pad - Cout)))

    grid = (M_pad // TM,)
    in_itemsize = jnp.dtype(compute_dtype).itemsize
    out_itemsize = jnp.dtype(out_dtype).itemsize
    cost = pl.CostEstimate(
        flops=2 * M_pad * K * N_pad,
        transcendentals=0,
        bytes_accessed=(M_pad * K * in_itemsize          # patches in
                        + K * N_pad * in_itemsize        # weight in
                        + N_pad * 4                      # bias in
                        + M_pad * N_pad * out_itemsize)) # output out

    out = pl.pallas_call(
        _conv_matmul_kernel,
        out_shape=jax.ShapeDtypeStruct((M_pad, N_pad), out_dtype),
        grid=grid,
        in_specs=[
            # Streamed row tiles of the im2col patches (double-buffered).
            pl.BlockSpec((TM, K), lambda i: (i, 0)),
            # Weight / bias are tiny -> full-array blocks, stay resident.
            pl.BlockSpec((K, N_pad), lambda i: (0, 0)),
            pl.BlockSpec((1, N_pad), lambda i: (0, 0)),
        ],
        out_specs=pl.BlockSpec((TM, N_pad), lambda i: (i, 0)),
        compiler_params=pltpu.CompilerParams(
            dimension_semantics=("parallel",),          # megacore-shard M (v7x)
            allow_input_fusion=[True, False, False],    # fuse im2col producer
            vmem_limit_bytes=32 * 1024 * 1024),         # safe on v5e/v6e/v7x
        cost_estimate=cost,
    )(patches, w, b)

    # Strip M/N padding; (M, Cout) -> NHWC without any transpose.
    feat_nhwc = out[:M, :Cout].reshape(B, Ho, Wo, Cout)
    return feat_nhwc


# ---------------------------------------------------------------------------
# BackboneBase equivalent.
# ---------------------------------------------------------------------------
class BackboneBasePallas:
    REDUCTION_MAP = {"reduction_3": 40, "reduction_4": 112}
    REDUCTION_STRIDE = {"reduction_3": 8, "reduction_4": 16}

    def __init__(self, in_channels: int, reduction: str, key, *,
                 compute_dtype=jnp.bfloat16, out_dtype=jnp.bfloat16):
        # TODO(synk): the real `body.extract_endpoints` is a full EfficientNet;
        # it is replaced by a deterministic synthetic strided-conv endpoint.
        self.reduction = reduction
        self.num_channels = self.REDUCTION_MAP[reduction]
        self.stride = self.REDUCTION_STRIDE[reduction]
        self.compute_dtype = compute_dtype   # bf16 MXU inputs (fp32 accumulate);
        self.out_dtype = out_dtype           # pass jnp.float32 for PyTorch-exact.
        k_w, k_b = jax.random.split(key)
        kdim = in_channels * self.stride * self.stride
        self.weight = (jax.random.normal(k_w, (kdim, self.num_channels),
                                         jnp.float32) / jnp.sqrt(kdim))
        self.bias = jax.random.normal(k_b, (1, self.num_channels),
                                      jnp.float32) * 0.01

    def __call__(self, tensors, *, channels_last: bool = True):
        # tensors: (B, C_in, H, W) NCHW, like the PyTorch module.
        feat_nhwc = _strided_conv_pallas(
            tensors, self.weight, self.bias, self.stride,
            compute_dtype=self.compute_dtype, out_dtype=self.out_dtype)
        B, Ho, Wo, _ = feat_nhwc.shape
        mask = jnp.zeros((B, Ho, Wo), dtype=jnp.bool_)
        if channels_last:
            x = feat_nhwc                                   # (B, Ho, Wo, C) fast path
        else:
            # PyTorch NCHW contract (costs one extra XLA layout pass).
            x = feat_nhwc.transpose(0, 3, 1, 2)             # (B, C, Ho, Wo)
        # NestedTensor(x, mask) -> plain (tensor, mask) tuple
        return {self.reduction: (x, mask)}


# ---------------------------------------------------------------------------
# Pure-JAX reference (same bf16-in / fp32-accumulate numerics as the kernel).
# ---------------------------------------------------------------------------
def _reference_conv(x, weight, bias, stride, compute_dtype=jnp.bfloat16,
                    out_dtype=jnp.bfloat16):
    B, Cin, H, W = x.shape
    Ho, Wo = H // stride, W // stride
    x = x[:, :, :Ho * stride, :Wo * stride]
    patches = x.reshape(B, Cin, Ho, stride, Wo, stride)
    patches = patches.transpose(0, 2, 4, 1, 3, 5).reshape(B * Ho * Wo, -1)
    acc = jnp.dot(patches.astype(compute_dtype), weight.astype(compute_dtype),
                  preferred_element_type=jnp.float32) + bias.astype(jnp.float32)
    return acc.astype(out_dtype).reshape(B, Ho, Wo, -1)


if __name__ == "__main__":
    key = jax.random.PRNGKey(0)
    k_p3, k_p4, k_x = jax.random.split(key, 3)

    B, Cin, H, W = 2, 3, 32, 32  # small NCHW image batch
    x = jax.random.normal(k_x, (B, Cin, H, W), jnp.float32)

    # --- reduction_3: stride 8, 40 channels -------------------------------
    bb3 = BackboneBasePallas(Cin, "reduction_3", k_p3)
    feat3, mask3 = bb3(x)["reduction_3"]           # default: NHWC fast path
    feat3 = jax.block_until_ready(feat3)
    mask3 = jax.block_until_ready(mask3)
    assert feat3.shape == (B, H // 8, W // 8, 40), feat3.shape
    assert feat3.dtype == jnp.bfloat16
    assert mask3.shape == (B, H // 8, W // 8) and mask3.dtype == jnp.bool_
    assert not bool(mask3.any())

    ref3 = _reference_conv(x, bb3.weight, bb3.bias, 8)
    err3 = float(jnp.max(jnp.abs(feat3.astype(jnp.float32)
                                 - ref3.astype(jnp.float32))))
    assert jnp.allclose(feat3.astype(jnp.float32), ref3.astype(jnp.float32),
                        atol=2e-2, rtol=2e-2), err3

    # NCHW branch matches the PyTorch module's layout contract.
    feat3_nchw, mask3_nchw = bb3(x, channels_last=False)["reduction_3"]
    feat3_nchw = jax.block_until_ready(feat3_nchw)
    assert feat3_nchw.shape == (B, 40, H // 8, W // 8), feat3_nchw.shape
    assert mask3_nchw.shape == (B, H // 8, W // 8)
    assert bool(jnp.array_equal(feat3_nchw, feat3.transpose(0, 3, 1, 2)))

    # --- reduction_4: stride 16, 112 channels (K=768, M < TM padding path) -
    bb4 = BackboneBasePallas(Cin, "reduction_4", k_p4)
    feat4, mask4 = bb4(x)["reduction_4"]
    feat4 = jax.block_until_ready(feat4)
    assert feat4.shape == (B, H // 16, W // 16, 112), feat4.shape
    assert mask4.shape == (B, H // 16, W // 16) and not bool(mask4.any())
    ref4 = _reference_conv(x, bb4.weight, bb4.bias, 16)
    assert jnp.allclose(feat4.astype(jnp.float32), ref4.astype(jnp.float32),
                        atol=2e-2, rtol=2e-2)

    print("KERNEL_OK")
</pallas_src>

<mosaic_0001>
module attributes {stable_mosaic.version = 11 : i64} {
  func.func @_conv_matmul_kernel(%arg0: i32, %arg1: memref<16x192xbf16, #tpu.memory_space<vmem>>, %arg2: memref<192x128xbf16, #tpu.memory_space<vmem>>, %arg3: memref<1x128xf32, #tpu.memory_space<vmem>>, %arg4: memref<16x128xbf16, #tpu.memory_space<vmem>>) attributes {dimension_semantics = [#tpu.dimension_semantics<parallel>], iteration_bounds = array<i64: 2>, scalar_prefetch = 0 : i64, scratch_operands = 0 : i64, tpu.core_type = #tpu.core_type<tc>, window_params = [{transform_indices = @transform_0, window_bounds = array<i64: 16, 192>}, {pipeline_mode = #tpu.pipeline_mode<synchronous>, transform_indices = @transform_1, window_bounds = array<i64: 192, 128>}, {pipeline_mode = #tpu.pipeline_mode<synchronous>, transform_indices = @transform_2, window_bounds = array<i64: 1, 128>}, {transform_indices = @transform_3, window_bounds = array<i64: 16, 128>}]} {
    %c0 = arith.constant 0 : index
    %c0_0 = arith.constant 0 : index
    %0 = vector.load %arg1[%c0, %c0_0] : memref<16x192xbf16, #tpu.memory_space<vmem>>, vector<16x192xbf16>
    %c0_1 = arith.constant 0 : index
    %c0_2 = arith.constant 0 : index
    %1 = vector.load %arg2[%c0_1, %c0_2] : memref<192x128xbf16, #tpu.memory_space<vmem>>, vector<192x128xbf16>
    %cst = arith.constant dense<0.000000e+00> : vector<16x128xf32>
    %2 = tpu.matmul %0, %1, %cst {dimension_numbers = #tpu.dot_dimension_numbers<[1], [0], [0], [1], [0, 0, 1, 1], [], []>} : vector<16x192xbf16>, vector<192x128xbf16>, vector<16x128xf32> -> vector<16x128xf32>
    %c0_3 = arith.constant 0 : index
    %c0_4 = arith.constant 0 : index
    %3 = vector.load %arg3[%c0_3, %c0_4] : memref<1x128xf32, #tpu.memory_space<vmem>>, vector<1x128xf32>
    %4 = vector.broadcast %3 : vector<1x128xf32> to vector<16x128xf32>
    %5 = arith.addf %2, %4 : vector<16x128xf32>
    %6 = arith.truncf %5 : vector<16x128xf32> to vector<16x128xbf16>
    %c0_5 = arith.constant 0 : index
    %c0_6 = arith.constant 0 : index
    %7 = vector.load %arg4[%c0_5, %c0_6] : memref<16x128xbf16, #tpu.memory_space<vmem>>, vector<16x128xbf16>
    tpu.vector_store %arg4[%c0_5, %c0_6], %6 {strides = array<i32>} : memref<16x128xbf16, #tpu.memory_space<vmem>>, vector<16x128xbf16>,
    return
  }
  func.func @transform_0(%arg0: i32) -> (i32, i32) {
    %c0_i32 = arith.constant 0 : i32
    %c0_i32_0 = arith.constant 0 : i32
    return %arg0, %c0_i32 : i32, i32
  }
  func.func @transform_1(%arg0: i32) -> (i32, i32) {
    %c0_i32 = arith.constant 0 : i32
    %c0_i32_0 = arith.constant 0 : i32
    %c0_i32_1 = arith.constant 0 : i32
    return %c0_i32, %c0_i32_0 : i32, i32
  }
  func.func @transform_2(%arg0: i32) -> (i32, i32) {
    %c0_i32 = arith.constant 0 : i32
    %c0_i32_0 = arith.constant 0 : i32
    %c0_i32_1 = arith.constant 0 : i32
    return %c0_i32, %c0_i32_0 : i32, i32
  }
  func.func @transform_3(%arg0: i32) -> (i32, i32) {
    %c0_i32 = arith.constant 0 : i32
    %c0_i32_0 = arith.constant 0 : i32
    return %arg0, %c0_i32 : i32, i32
  }
}

</mosaic_0001>

<bundles_post_ra>
// kernel: tpu_custom_call.1
= control target key start
LH: loop header
LB: loop body
LE: loop exit
PB: predicated region body
PF: predicated region fallthrough
CT: control target
= control target key end

     0   :  { %8 = vsyncpa [#allocation3], 0  ;;  %s937_s0 = inlined_call_operand.hbm [shape: bf16[32,192], index: 0, kind: input, shape index: {}]   ;;  %s938_s1 = inlined_call_operand.hbm [shape: bf16[192,128], index: 1, kind: input, shape index: {}]   ;;  %s939_s2 = inlined_call_operand.vmem [shape: f32[1,128], index: 2, kind: input, shape index: {}]   ;;  %s940_s3 = inlined_call_operand.hbm [shape: bf16[32,128], index: 3, kind: output, shape index: {}]  }
   0x1   :  { %10 = vsyncpa [#allocation3 + $0x1], 0 }
   0x2   :  { %11 = vsyncpa [#allocation6], 0 }
   0x3   :  { %12 = vsyncpa [#allocation4], 0 }
   0x4   :  { %14 = vsyncpa [#allocation4 + $0x1], 0  ;;  %s752_s12 = smov 0   ;;  %s754_s13 = smov 0  }
   0x5   :  { %s756_s14 = smov 0   ;;  %s758_s15 = smov 0  }
   0x6 LB: > { %s773_s16 = sadd.s32 4294967295, %s720_s15   ;;  %s474_s17 = sadd.s32 4294967294, %s720_s15   ;;  %s720_s15 = sphi %s758_s15, %s962_s15   ;;  %s716_s14 = sphi %s756_s14, %s961_s14   ;;  %s712_s13 = sphi %s754_s13, %s960_s13   ;;  %s708_s12 = sphi %s752_s12, %s959_s12  }
   0x7   : > { %p40_p0 = scmp.ne.s32.totalorder %s712_s13, %s708_s12  ;;  %p941_p1 = scmp.eq.s32.totalorder %s773_s16, 0 }
   0x8   : > { %p112_p3 = scmp.eq.s32.totalorder %s474_s17, 1  ;;  %p475_p5 = scmp.ge.s32.totalorder %s720_s15, 1 }
   0x9   : > { %p782_p4 = por %p941_p1, %p40_p0  ;;  %p119_p7 = scmp.lt.s32.totalorder %s720_s15, 3 }
   0xa   : > { %p787_p6 = por %p112_p3, %p40_p0  ;;  %s722_s21 = smov [#allocation5]  }
   0xb   : > { %s945_s18 = scalar_select %p782_p4, 1, 0 }
   0xc   : > { %s946_s19 = scalar_select %p787_p6, 1, 0 }
   0xd   : > { %p792_p8 = pnand %p475_p5, %p119_p7  ;;  %s131_s22 = sshll.u32 %s722_s21, 4  ;;  %s132_s22 = int_to_ptr.vmem [resolvable:$true] %s131_s22 }
   0xe   : > { %s806_s24 = sadd.s32 1, %s720_s15   ;;  %s27_s25 = sadd.s32 1, %s716_s14 }
   0xf   : > { %s947_s20 = scalar_select %p792_p8, 1, 0 }
  0x10   : > { %p527_p9 = pneg %p792_p8  ;;  %s24_s26 = ssub.s32 %s720_s15, %s806_s24 }
  0x11   : > { %s609_s27 = scalar_lea.vmem %s132_s22, 1536  ;;  %p617_p5 = scmp.lt.s32.totalorder %s132_s22, %s132_s22 }
  0x12   : > { %p801_p11 = pnand %p527_p9, %p941_p1  ;;  %p610_p13 = scmp.ne.s32.totalorder %s132_s22, %s609_s27 }
  0x13   : > { %p618_p7 = scmp.lt.s32.totalorder %s609_s27, %s609_s27 }
  0x14   : > { %p600_p12 = pneg %p801_p11 }
  0x15   : > { %p619_p10 = por %p618_p7, %p617_p5 }
  0x16   : > { %p612_p0 = pnand %p610_p13, %p600_p12 }
  0x18   : > { %p613_p3 = pneg %p612_p0 }
  0x1a   : > { %p620_p2 = pnand %p619_p10, %p613_p3 }
  0x1c   : > { %623 = shalt.err (!%p620_p2)
}
  0x1d   : > { %s723_s28 = smov 64   ;;  %s724_s29 = smov 4  }
  0x1e   : > { %530 = dma.hbm_to_vmem [thread:$0]  (!%p801_p11), %s938_s1, 1536, %s132_s22, [#allocation6], %s723_s28, %s723_s28, %s724_s29  }
  0x1f   : > { %p25_p9 = scmp.eq.s32.totalorder %s24_s26, 0  ;;  %p34_p12 = scmp.ne.s32.totalorder %s716_s14, %s712_s13 }
  0x20   : > { %p35_p10 = scmp.eq.s32.totalorder %s720_s15, 0  ;;  %p540_p2 = scmp.lt.s32.totalorder %s720_s15, 2 }
  0x21   : > { %s823_s5 = scalar_select %p25_p9, %s716_s14, %s27_s25  }
  0x22   : > { %p36_p13 = por %p35_p10, %p34_p12  ;;  %p949_p0 = scmp.eq.s32.totalorder %s773_s16, 1 }
  0x23   : > { %s148_s7 = sand.u32 1, %s716_s14   ;;  %s510_s8 = sshll.u32 %s720_s15, 8 }
  0x24   : > { %p827_p3 = por %p949_p0, %p34_p12  ;;  %s478_s9 = sshll.u32 %s148_s7, 4 }
  0x25   : > { %s836_s17 = scalar_lea.hbm %s937_s0, %s510_s8  ;;  %s152_s21 = scalar_lea.vmem [#allocation2], %s478_s9 }
  0x26   : > { %s950_s6 = scalar_select %p827_p3, 1, 0 }
  0x27   : > { %s160_s22 = sshll.u32 %s152_s21, 4  ;;  %p838_p11 = pnand %p540_p2, %p36_p13  ;;  %s842_s22 = int_to_ptr.vmem [resolvable:$true] %s160_s22 }
  0x28   : > { %s844_s25 = scalar_lea.sflag [#allocation3], %s148_s7  ;;  %s624_s26 = scalar_lea.hbm %s836_s17, 256 }
  0x29   : > { %p625_p5 = scmp.ne.s32.totalorder %s836_s17, %s624_s26  ;;  %p626_p7 = pneg %p838_p11 }
  0x2a   : > { %s629_s29 = scalar_lea.hbm %s937_s0, 512  ;;  %p630_p10 = scmp.lt.s32.totalorder %s836_s17, %s937_s0 }
  0x2b   : > { %p627_p9 = pnand %p626_p7, %p625_p5  ;;  %p631_p2 = scmp.lt.s32.totalorder %s629_s29, %s624_s26 }
  0x2d   : > { %p628_p12 = pneg %p627_p9  ;;  %p632_p13 = por %p631_p2, %p630_p10 }
  0x2f   : > { %p633_p0 = pnand %p632_p13, %p628_p12 }
  0x31   : > { %636 = shalt.err (!%p633_p0)
}
  0x32   : > { %s637_s7 = scalar_lea.vmem %s842_s22, 256  ;;  %s725_s8 = smov [#allocation2]  }
  0x33   : > { %p638_p1 = scmp.ne.s32.totalorder %s842_s22, %s637_s7  ;;  %s642_s9 = sshll.u32 %s725_s8, 4  ;;  %s643_s9 = int_to_ptr.vmem [resolvable:$false] %s642_s9 }
  0x34   : > { %s644_s10 = scalar_lea.vmem %s643_s9, 512  ;;  %p645_p9 = scmp.lt.s32.totalorder %s842_s22, %s643_s9 }
  0x35   : > { %p640_p6 = pnand %p638_p1, %p626_p7  ;;  %p646_p3 = scmp.lt.s32.totalorder %s644_s10, %s637_s7 }
  0x37   : > { %p641_p5 = pneg %p640_p6  ;;  %p647_p4 = por %p646_p3, %p645_p9 }
  0x39   : > { %p648_p8 = pnand %p647_p4, %p641_p5 }
  0x3b   : > { %651 = shalt.err (!%p648_p8)
}
  0x3c   : > { %s726_s11 = smov 128   ;;  %s727_s21 = smov 8  }
  0x3d   : > { %534 = dma.hbm_to_vmem [thread:$0]  (!%p838_p11), %s836_s17, 256, %s842_s22, %s844_s25, %s726_s11, %s726_s11, %s727_s21  }
  0x3e   : > { %p952_p1 = scmp.ne.s32.totalorder %s947_s20, 0 }
  0x3f   : > { %s868_s26 = sand.u32 (!%p952_p1), 1, %s712_s13   ;;  %p953_p4 = scmp.ne.s32.totalorder (!%p952_p1), %s945_s18, 0 }
  0x40   : > { %172 = sbr.rel (%p952_p1) target bundleno = 337 (0x151), region = 32  ;;  %s483_s27 = sshll.u32 (!%p952_p1), %s868_s26, 4 }
  0x41   : > { %s175_s28 = scalar_lea.sflag (!%p952_p1), [#allocation3], %s868_s26  ;;  %s872_s29 = scalar_lea.vmem (!%p952_p1), [#allocation2], %s483_s27 }
  0x45   : > { %695 = dma.done.wait (%p953_p4), %s175_s28, 256  }
  0x46   : > { %697 = vsyncadd (%p953_p4), %s175_s28, 4294967040  ;;  %p954_p6 = scmp.eq.s32.totalorder %s773_s16, 0 }
  0x48   : > { %699 = dma.done.wait (%p954_p6), [#allocation6], 1536   ;;  %p955_p8 = pmov %p954_p6 }
  0x49   : > { %v728_v0 = vmov 0   ;;  %v583_v1 = vld [vmem:[#allocation5 + $0x38] sm:$0xff]   ;;  %v584_v2 = vld [vmem:[#allocation5 + $0x30] sm:$0xff]   ;;  %v585_v3 = vld [vmem:[#allocation5 + $0x28] sm:$0xff]   ;;  %vm322_vm0 = vcmask 523264   ;;  %s485_s18 = sshll.u32 %s868_s26, 3 }
  0x4a   : > { %701 = vsyncadd (%p955_p8), [#allocation6], 4294965760  ;;  %326 = vmatprep.subr.bf16.mxu0 %v728_v0  ;;  %v586_v4 = vld [vmem:[#allocation5 + $0x20] sm:$0xff]   ;;  %v587_v6 = vld [vmem:[#allocation5 + $0x18] sm:$0xff]   ;;  %s204_s22 = scalar_lea.vmem [#allocation7], %s485_s18  ;;  %s513_s25 = sshll.u32 %s773_s16, 7 }
  0x4b   : > { %327 = vmatpush1.bf16.msra.mxu0 %v583_v1  ;;  %v597_v5 = vld [vmem:[%s872_s29 + $0x4] ss:$8 sps:$4 sm:$0xff]   ;;  %v595_v14 = vld [vmem:[%s872_s29] ss:$8 sps:$4 sm:$0xff]   ;;  %s391_s23 = sshll.u32 %s204_s22, 4  ;;  %s894_s7 = scalar_lea.hbm %s940_s3, %s513_s25  ;;  %s889_s23 = int_to_ptr.vmem [resolvable:$true] %s391_s23 }
  0x4c   : > { %328 = vmatprep.subr.bf16.mxu0 %v728_v0  ;;  %501 = vmatprep.mubr.msk.bf16.mxu0 %vm322_vm0, %v597_v5  ;;  %v588_v7 = vld [vmem:[#allocation5 + $0x10] sm:$0xff]   ;;  %v589_v8 = vld [vmem:[#allocation5 + $0x8] sm:$0xff]   ;;  %v590_v9 = vld [vmem:[#allocation5] sm:$0xff]   ;;  %s378_s8 = scalar_lea.sflag [#allocation4], %s868_s26  ;;  %s652_s9 = scalar_lea.vmem %s889_s23, 128 }
  0x4d   : > { %v591_v10 = vld [vmem:[#allocation5 + $0x58] sm:$0xff]   ;;  %v592_v11 = vld [vmem:[#allocation5 + $0x50] sm:$0xff]   ;;  %v593_v12 = vld [vmem:[#allocation5 + $0x48] sm:$0xff]   ;;  %p653_p3 = scmp.ne.s32.totalorder %s889_s23, %s652_s9  ;;  %p956_p11 = scmp.ne.s32.totalorder %s950_s6, 0 }
  0x4e   : > { %v594_v13 = vld [vmem:[#allocation5 + $0x40] sm:$0xff]   ;;  %s729_s16 = smov [#allocation7]  }
  0x4f   : > { %329 = vmatpush1.bf16.msra.mxu0 %v584_v2  ;;  %v486_v16 = vld [vmem:[%s939_s2] ss:$0 sm:$0xff]  ;;  %p654_p7 = pnand %p653_p3, %p956_p11  ;;  %s656_s10 = sshll.u32 %s729_s16, 4  ;;  %s657_s10 = int_to_ptr.vmem [resolvable:$false] %s656_s10 }
  0x50   : > { %330 = vmatprep.subr.bf16.mxu0 %v728_v0  ;;  %s658_s11 = scalar_lea.vmem %s657_s10, 256  ;;  %p659_p10 = scmp.lt.s32.totalorder %s889_s23, %s657_s10 }
  0x51   : > { %p655_p12 = pneg %p654_p7  ;;  %p660_p2 = scmp.lt.s32.totalorder %s658_s11, %s652_s9 }
  0x53   : > { %331 = vmatpush1.bf16.msra.mxu0 %v585_v3  ;;  %p661_p13 = por %p660_p2, %p659_p10 }
  0x54   : > { %332 = vmatprep.subr.bf16.mxu0 %v728_v0 }
  0x55   : > { %p662_p0 = pnand %p661_p13, %p655_p12 }
  0x57   : > { %333 = vmatpush1.bf16.msra.mxu0 %v586_v4 }
  0x58   : > { %334 = vmatprep.subr.bf16.mxu0 %v728_v0 }
  0x5b   : > { %335 = vmatpush1.bf16.msra.mxu0 %v587_v6 }
  0x5c   : > { %336 = vmatprep.subr.bf16.mxu0 %v728_v0 }
  0x5f   : > { %337 = vmatpush1.bf16.msra.mxu0 %v588_v7 }
  0x60   : > { %338 = vmatprep.subr.bf16.mxu0 %v728_v0 }
  0x63   : > { %339 = vmatpush1.bf16.msra.mxu0 %v589_v8 }
  0x64   : > { %340 = vmatprep.subr.bf16.mxu0 %v728_v0 }
  0x67   : > { %341 = vmatpush1.bf16.msra.mxu0 %v590_v9 }
  0x68   : > { %350 = vmatprep.subr.bf16.mxu0 %v728_v0 }
  0x6b   : > { %351 = vmatpush2.bf16.msra.mxu0 %v591_v10 }
  0x6c   : > { %352 = vmatprep.subr.bf16.mxu0 %v728_v0 }
  0x6f   : > { %353 = vmatpush2.bf16.msra.mxu0 %v592_v11 }
  0x70   : > { %354 = vmatprep.subr.bf16.mxu0 %v728_v0 }
  0x73   : > { %355 = vmatpush2.bf16.msra.mxu0 %v593_v12 }
  0x74   : > { %356 = vmatprep.subr.bf16.mxu0 %v728_v0 }
  0x77   : > { %357 = vmatpush2.bf16.msra.mxu0 %v594_v13 }
  0x7a   : > { %359 = vmatmul.mubr.bf16.vlgmr.msra.gmra.mxu0 %v595_v14 }
 0x13a   : > { %v360_v15 = vpop.f32.mrf.mxu0 }
 0x13b   : > { %v361_v19 = vadd.f32 %v486_v16, %v360_v15 }
 0x13c   : > { %v362_v17 = vpop.f32.mrf.mxu0 }
 0x13e   : > { %v363_v18 = vpop.f32.mrf.mxu0 }
 0x13f   : > { %v364_v20 = vadd.f32 %v486_v16, %v363_v18 }
 0x140   : > { %v365_v21 = vpop.f32.mrf.mxu0 }
 0x141   : > { %v517_v22 = vpack.c.bf16 %v364_v20, %v361_v19 }
 0x143   : > { %518 = vst [vmem:[%s204_s22] sm:$0xff] %v517_v22  }
 0x144   : > { %665 = shalt.err (!%p662_p0)
}
 0x145   : > { %s666_s21 = scalar_lea.hbm %s894_s7, 128  ;;  %s670_s29 = scalar_lea.hbm %s940_s3, 256 }
 0x146   : > { %p667_p5 = scmp.ne.s32.totalorder %s894_s7, %s666_s21  ;;  %p671_p4 = scmp.lt.s32.totalorder %s894_s7, %s940_s3 }
 0x147   : > { %p672_p6 = scmp.lt.s32.totalorder %s670_s29, %s666_s21 }
 0x148   : > { %p668_p9 = pnand %p667_p5, %p956_p11 }
 0x149   : > { %p673_p8 = por %p672_p6, %p671_p4 }
 0x14a   : > { %p669_p1 = pneg %p668_p9 }
 0x14c   : > { %p674_p3 = pnand %p673_p8, %p669_p1 }
 0x14e   : > { %677 = shalt.err (!%p674_p3)
}
 0x14f   : > { %s730_s17 = smov 64   ;;  %s731_s22 = smov 4  }
 0x150   : > { %525 = dma.vmem_to_hbm [thread:$0]  (%p956_p11), %s889_s23, 128, %s894_s7, %s378_s8, %s730_s17, %s730_s17, %s731_s22  }
 0x151 PF: > { %s406_s25 = sand.u32 1, %s708_s12   ;;  %p957_p7 = scmp.ne.s32.totalorder %s946_s19, 0 }
 0x152   : > { %p958_p12 = scmp.ge.s32.totalorder %s720_s15, 2  ;;  %s407_s30 = scalar_lea.sflag [#allocation4], %s406_s25 }
 0x154   : > { %p536_p10 = pnand %p958_p12, %p957_p7 }
 0x156   : > { %p537_p2 = pneg %p536_p10 }
 0x158   : > { %703 = dma.done.wait (%p537_p2), %s407_s30, 128  }
 0x159   : > { %705 = vsyncadd (%p537_p2), %s407_s30, 4294967168  ;;  %p17_p13 = scmp.ge.s32.totalorder %s806_s24, 4   ;;  %s959_s12 = smov %s712_s13 }
 0x15a   : > { %s960_s13 = smov %s716_s14  ;;  %s961_s14 = smov %s823_s5 }
 0x15b   : > { %s962_s15 = smov %s806_s24  ;;  %19 = sbr.rel (!%p17_p13) target bundleno = 6 (0x6), region = 81 }
 0x160   :  { %412 = vsyncpa [#allocation3], 1 }
 0x161   :  { %414 = vsyncpa [#allocation3 + $0x1], 1 }
 0x162   :  { %415 = vsyncpa [#allocation6], 1 }
 0x163   :  { %416 = vsyncpa [#allocation4], 1 }
 0x164   :  { %418 = vsyncpa [#allocation4 + $0x1], 1 }

</bundles_post_ra>
